<compile_context>
chip_gen: v5e
topology: v5e:2x2
jax: 0.10.0
libtpu: 0.0.40
codegen_flags: <defaults>
</compile_context>

<pallas_src>
import functools

import jax
import jax.numpy as jnp
from jax.experimental import pallas as pl
from jax.experimental.pallas import tpu as pltpu


# --------------------------------------------------------------------------
# VMEM budget (per generation)
# --------------------------------------------------------------------------
def _vmem_budget():
    """Returns (working-set budget, vmem_limit_bytes)."""
    try:
        cap = pltpu.get_tpu_info().vmem_capacity_bytes
    except Exception:
        cap = 64 * 1024 * 1024                     # conservative (v7x per-TC)
    limit = (cap * 3) // 4                         # 96 MiB v5e/v6e, 48 MiB v7x
    return (limit * 4) // 5, limit                 # ~20% compiler headroom


# --------------------------------------------------------------------------
# Fused-im2col path (stride == 1, any padding / dilation / kernel size)
# --------------------------------------------------------------------------
def _fused_conv_kernel(w_ref, x_ref, o_ref, acc_ref, *,
                       tap_offsets, span, n_k, negative_slope):
    """One grid step = (batch, C_out-tile, C_in-tile).

    w_ref:   (KH*KW, TCo, TCi)  per-tap weight matrices (VMEM-resident)
    x_ref:   (1, TCi, S)        flat zero-padded activations (read once)
    o_ref:   (1, TCo, span)     flat output tile (span = H_out*Wp layout)
    acc_ref: (TCo, span) f32    accumulator across the C_in grid axis
    """
    k = pl.program_id(2)

    @pl.when(k == 0)
    def _init():
        acc_ref[...] = jnp.zeros_like(acc_ref)

    acc = acc_ref[...]
    for t, off in enumerate(tap_offsets):          # taps formed in VMEM only
        acc = acc + jnp.dot(w_ref[t], x_ref[0, :, off:off + span],
                            preferred_element_type=jnp.float32)
    acc_ref[...] = acc

    @pl.when(k == n_k - 1)
    def _store():
        y = acc_ref[...]
        if negative_slope is not None:             # LeakyReLU in f32
            y = jnp.where(y >= 0, y, y * negative_slope)
        o_ref[0] = y.astype(o_ref.dtype)


def _conv_fused(x, weight, *, padding, dilation, negative_slope, cdt, out_dtype):
    N, C_in, H, W = x.shape
    C_out, _, KH, KW = weight.shape
    p, d = padding, dilation
    Hp, Wp = H + 2 * p, W + 2 * p
    H_out = Hp - d * (KH - 1)
    W_out = Wp - d * (KW - 1)
    if H_out <= 0 or W_out <= 0:
        return None
    span = H_out * Wp                              # flat output length (width-Wp layout)
    tail = d * (KW - 1)
    S = Hp * Wp + tail                             # flat input length (tail-padded)

    in_item = jnp.dtype(cdt).itemsize
    out_item = jnp.dtype(out_dtype).itemsize
    budget, vmem_limit = _vmem_budget()

    def ws(tci, tco):                              # double-buffered working set
        return (2 * tci * S * in_item              #   x tiles
                + 2 * KH * KW * tco * tci * in_item  # weights
                + 2 * tco * span * out_item          # output tiles
                + 2 * tco * span * 4                 # f32 accumulator + temp
                + 2 * tci * span * in_item)          # tap-slice temporaries

    tci_cands = [C_in] + [c for c in (256, 128) if c < C_in and C_in % c == 0]
    tco_cands = [C_out] + [c for c in (256, 128, 64, 32, 16, 8)
                           if c < C_out and C_out % c == 0]
    choice = None
    for tco in tco_cands:                          # prefer whole C_out, then whole C_in
        for tci in tci_cands:
            if ws(tci, tco) <= budget:
                choice = (tci, tco)
                break
        if choice is not None:
            break
    if choice is None:
        return None                                # caller falls back to im2col path
    tci, tco = choice
    n_k = C_in // tci
    n_j = C_out // tco
    # v7x dual-TC: expose >= 2 parallel blocks when the batch alone can't.
    if N == 1 and n_j == 1 and C_out % 16 == 0:
        tco = C_out // 2
        n_j = 2

    # ---- glue (XLA): cast, zero-pad, flatten spatial; no im2col expansion ----
    xq = x.astype(cdt)
    xp = jnp.pad(xq, ((0, 0), (0, 0), (p, p), (p, p)))
    x_flat = xp.reshape(N, C_in, Hp * Wp)
    if tail:
        x_flat = jnp.pad(x_flat, ((0, 0), (0, 0), (0, tail)))
    # (KH*KW, C_out, C_in): w_t[t] is the (C_out, C_in) matrix of tap t.
    w_t = jnp.transpose(weight, (2, 3, 0, 1)).reshape(KH * KW, C_out, C_in).astype(cdt)

    tap_offsets = tuple(kh * d * Wp + kw * d for kh in range(KH) for kw in range(KW))

    kernel = functools.partial(_fused_conv_kernel, tap_offsets=tap_offsets,
                               span=span, n_k=n_k, negative_slope=negative_slope)
    out_flat = pl.pallas_call(
        kernel,
        out_shape=jax.ShapeDtypeStruct((N, C_out, span), out_dtype),
        grid_spec=pltpu.PrefetchScalarGridSpec(
            num_scalar_prefetch=0,
            grid=(N, n_j, n_k),
            in_specs=[
                pl.BlockSpec((KH * KW, tco, tci), lambda n, j, k: (0, j, k)),
                pl.BlockSpec((1, tci, S), lambda n, j, k: (n, k, 0)),
            ],
            out_specs=pl.BlockSpec((1, tco, span), lambda n, j, k: (n, j, 0)),
            scratch_shapes=[pltpu.VMEM((tco, span), jnp.float32)],
        ),
        compiler_params=pltpu.CompilerParams(
            dimension_semantics=("parallel", "parallel", "arbitrary"),
            vmem_limit_bytes=vmem_limit,
        ),
    )(w_t, x_flat)

    # Valid columns are 0..W_out-1 of each width-Wp row; drop the wrap garbage.
    return out_flat.reshape(N, C_out, H_out, Wp)[:, :, :, :W_out]


# --------------------------------------------------------------------------
# im2col fallback path (stride > 1, or fused working set does not fit VMEM)
# --------------------------------------------------------------------------
def _im2col_kernel(w_ref, p_ref, o_ref, *, negative_slope):
    y = jnp.dot(w_ref[...], p_ref[0], preferred_element_type=jnp.float32)
    if negative_slope is not None:
        y = jnp.where(y >= 0, y, y * negative_slope)
    o_ref[0] = y.astype(o_ref.dtype)


def _conv_im2col(x, weight, *, stride, padding, dilation, negative_slope,
                 cdt, out_dtype):
    N, C_in, H, W = x.shape
    C_out, _, KH, KW = weight.shape
    s, p, d = stride, padding, dilation
    H_out = (H + 2 * p - d * (KH - 1) - 1) // s + 1
    W_out = (W + 2 * p - d * (KW - 1) - 1) // s + 1
    HW = H_out * W_out
    K = KH * KW * C_in
    in_item = jnp.dtype(cdt).itemsize
    out_item = jnp.dtype(out_dtype).itemsize
    budget, vmem_limit = _vmem_budget()

    def ws(thw):
        return (2 * thw * K * in_item + 2 * thw * C_out * out_item
                + 2 * C_out * K * in_item + C_out * thw * 4)

    hw128 = -(-HW // 128) * 128
    if ws(hw128) <= budget:
        thw = hw128
    else:
        thw = 128
        while thw * 2 < hw128 and ws(thw * 2) <= budget:
            thw *= 2
    HW_pad = -(-HW // thw) * thw                   # pad instead of exact divisor

    xp = jnp.pad(x.astype(cdt), ((0, 0), (0, 0), (p, p), (p, p)))
    taps = []
    for kh in range(KH):
        for kw in range(KW):
            h0, w0 = kh * d, kw * d
            tap = xp[:, :, h0:h0 + s * (H_out - 1) + 1:s,
                           w0:w0 + s * (W_out - 1) + 1:s]
            taps.append(tap.reshape(N, C_in, HW))
    patches = jnp.concatenate(taps, axis=1)                        # (N, K, HW)
    if HW_pad > HW:
        patches = jnp.pad(patches, ((0, 0), (0, 0), (0, HW_pad - HW)))
    w2 = jnp.transpose(weight, (0, 2, 3, 1)).reshape(C_out, K).astype(cdt)

    out_flat = pl.pallas_call(
        functools.partial(_im2col_kernel, negative_slope=negative_slope),
        out_shape=jax.ShapeDtypeStruct((N, C_out, HW_pad), out_dtype),
        grid_spec=pltpu.PrefetchScalarGridSpec(
            num_scalar_prefetch=0,
            grid=(N, HW_pad // thw),
            in_specs=[
                pl.BlockSpec((C_out, K), lambda n, j: (0, 0)),     # resident
                pl.BlockSpec((1, K, thw), lambda n, j: (n, 0, j)),
            ],
            out_specs=pl.BlockSpec((1, C_out, thw), lambda n, j: (n, 0, j)),
        ),
        compiler_params=pltpu.CompilerParams(
            dimension_semantics=("parallel", "parallel"),
            vmem_limit_bytes=vmem_limit,
        ),
    )(w2, patches)
    return out_flat[:, :, :HW].reshape(N, C_out, H_out, W_out)


# --------------------------------------------------------------------------
# Public entry point: nn.Conv2d(bias=False) -> LeakyReLU(negative_slope)
# --------------------------------------------------------------------------
def conv2d_act(x, weight, *, stride=1, padding=0, dilation=1,
               negative_slope=0.1, compute_dtype=jnp.bfloat16):
    """Pass negative_slope=None for act=None."""
    cdt = jnp.dtype(compute_dtype) if compute_dtype is not None else jnp.dtype(x.dtype)
    out_dtype = x.dtype
    if stride == 1:
        out = _conv_fused(x, weight, padding=padding, dilation=dilation,
                          negative_slope=negative_slope, cdt=cdt, out_dtype=out_dtype)
        if out is not None:
            return out
    return _conv_im2col(x, weight, stride=stride, padding=padding, dilation=dilation,
                        negative_slope=negative_slope, cdt=cdt, out_dtype=out_dtype)


# --------------------------------------------------------------------------
# Self-test
# --------------------------------------------------------------------------
if __name__ == "__main__":
    def make_inputs(key, n, c_in, c_out, h, w, kh, kw):
        kx, kwt = jax.random.split(key)
        x = jax.random.normal(kx, (n, c_in, h, w), dtype=jnp.float32)
        bound = 1.0 / ((c_in * kh * kw) ** 0.5)    # nn.Conv2d kaiming_uniform bound
        wgt = jax.random.uniform(kwt, (c_out, c_in, kh, kw), dtype=jnp.float32,
                                 minval=-bound, maxval=bound)
        return x, wgt

    def reference(x, w, *, stride, padding, dilation, negative_slope, cast_bf16):
        if cast_bf16:
            x = x.astype(jnp.bfloat16).astype(jnp.float32)
            w = w.astype(jnp.bfloat16).astype(jnp.float32)
        y = jax.lax.conv_general_dilated(
            x, w, window_strides=(stride, stride),
            padding=((padding, padding), (padding, padding)),
            rhs_dilation=(dilation, dilation),
            dimension_numbers=("NCHW", "OIHW", "NCHW"),
            precision=jax.lax.Precision.HIGHEST)
        if negative_slope is not None:
            y = jnp.where(y >= 0, y, y * negative_slope)
        return y

    # 1) Module default forward: conv3x3 (s=1, p=1, bias=False) -> LeakyReLU(0.1),
    #    bf16 operands (default), fused-im2col path.
    x, w = make_inputs(jax.random.PRNGKey(0), 2, 4, 4, 16, 16, 3, 3)
    out = jax.block_until_ready(conv2d_act(x, w, stride=1, padding=1))
    r = reference(x, w, stride=1, padding=1, dilation=1, negative_slope=0.1,
                  cast_bf16=True)
    assert out.shape == r.shape and out.dtype == x.dtype
    assert jnp.allclose(out, r, atol=5e-3, rtol=5e-3), "mismatch (fused, C=4, bf16)"

    # 2) f32 operands, wide channels — checks the fused layout exactly.
    x2, w2 = make_inputs(jax.random.PRNGKey(1), 2, 128, 128, 16, 16, 3, 3)
    out2 = jax.block_until_ready(
        conv2d_act(x2, w2, padding=1, compute_dtype=jnp.float32))
    r2 = reference(x2, w2, stride=1, padding=1, dilation=1, negative_slope=0.1,
                   cast_bf16=False)
    assert jnp.allclose(out2, r2, atol=2e-3, rtol=2e-3), "mismatch (fused, C=128, f32)"

    # 3) Default bf16 operands on the wide case.
    out3 = jax.block_until_ready(conv2d_act(x2, w2, padding=1))
    r3 = reference(x2, w2, stride=1, padding=1, dilation=1, negative_slope=0.1,
                   cast_bf16=True)
    assert jnp.allclose(out3, r3, atol=2e-2, rtol=2e-2), "mismatch (fused, C=128, bf16)"

    # 4) nn.Conv2d default padding=0, with dilation=2 (fused path, offsets).
    x4, w4 = make_inputs(jax.random.PRNGKey(2), 2, 8, 16, 16, 16, 3, 3)
    out4 = jax.block_until_ready(
        conv2d_act(x4, w4, padding=0, dilation=2, compute_dtype=jnp.float32))
    r4 = reference(x4, w4, stride=1, padding=0, dilation=2, negative_slope=0.1,
                   cast_bf16=False)
    assert out4.shape == r4.shape
    assert jnp.allclose(out4, r4, atol=2e-3, rtol=2e-3), "mismatch (fused, d=2, p=0)"

    # 5) stride=2 exercises the im2col fallback path.
    out5 = jax.block_until_ready(
        conv2d_act(x4, w4, stride=2, padding=1, compute_dtype=jnp.float32))
    r5 = reference(x4, w4, stride=2, padding=1, dilation=1, negative_slope=0.1,
                   cast_bf16=False)
    assert out5.shape == r5.shape
    assert jnp.allclose(out5, r5, atol=2e-3, rtol=2e-3), "mismatch (im2col, s=2)"

    print("KERNEL_OK")
</pallas_src>

<mosaic_0001>
module attributes {stable_mosaic.version = 11 : i64} {
  func.func @_fused_conv_kernel(%arg0: i32, %arg1: i32, %arg2: i32, %arg3: memref<9x4x4xbf16, #tpu.memory_space<vmem>>, %arg4: memref<1x4x326xbf16, #tpu.memory_space<vmem>>, %arg5: memref<1x4x288xf32, #tpu.memory_space<vmem>>, %arg6: memref<4x288xf32, #tpu.memory_space<vmem>>) attributes {dimension_semantics = [#tpu.dimension_semantics<parallel>, #tpu.dimension_semantics<parallel>, #tpu.dimension_semantics<arbitrary>], iteration_bounds = array<i64: 2, 1, 1>, scalar_prefetch = 0 : i64, scratch_operands = 1 : i64, tpu.core_type = #tpu.core_type<tc>, window_params = [{transform_indices = @transform_0, window_bounds = array<i64: 9, 4, 4>}, {transform_indices = @transform_1, window_bounds = array<i64: 1, 4, 326>}, {transform_indices = @transform_2, window_bounds = array<i64: 1, 4, 288>}]} {
    %c0_i32 = arith.constant 0 : i32
    %0 = arith.cmpi eq, %arg2, %c0_i32 : i32
    %1 = arith.extui %0 : i1 to i32
    %c0_i32_0 = arith.constant 0 : i32
    %2 = arith.cmpi ne, %1, %c0_i32_0 : i32
    scf.if %2 {
      %cst_54 = arith.constant 0.000000e+00 : f32
      %62 = vector.broadcast %cst_54 : f32 to vector<4x288xf32>
      %c0_55 = arith.constant 0 : index
      %c0_56 = arith.constant 0 : index
      %63 = vector.load %arg6[%c0_55, %c0_56] : memref<4x288xf32, #tpu.memory_space<vmem>>, vector<4x288xf32>
      tpu.vector_store %arg6[%c0_55, %c0_56], %62 {strides = array<i32>} : memref<4x288xf32, #tpu.memory_space<vmem>>, vector<4x288xf32>,
    } else {
    }
    %c0 = arith.constant 0 : index
    %c0_1 = arith.constant 0 : index
    %3 = vector.load %arg6[%c0, %c0_1] : memref<4x288xf32, #tpu.memory_space<vmem>>, vector<4x288xf32>
    %c0_2 = arith.constant 0 : index
    %c0_3 = arith.constant 0 : index
    %c0_4 = arith.constant 0 : index
    %4 = vector.load %arg3[%c0_2, %c0_3, %c0_4] : memref<9x4x4xbf16, #tpu.memory_space<vmem>>, vector<1x4x4xbf16>
    %5 = vector.shape_cast %4 : vector<1x4x4xbf16> to vector<4x4xbf16>
    %c0_5 = arith.constant 0 : index
    %c0_6 = arith.constant 0 : index
    %c0_7 = arith.constant 0 : index
    %6 = vector.load %arg4[%c0_5, %c0_6, %c0_7] : memref<1x4x326xbf16, #tpu.memory_space<vmem>>, vector<1x4x288xbf16>
    %7 = vector.shape_cast %6 : vector<1x4x288xbf16> to vector<4x288xbf16>
    %cst = arith.constant dense<0.000000e+00> : vector<4x288xf32>
    %8 = tpu.matmul %5, %7, %cst {dimension_numbers = #tpu.dot_dimension_numbers<[1], [0], [0], [1], [0, 0, 1, 1], [], []>} : vector<4x4xbf16>, vector<4x288xbf16>, vector<4x288xf32> -> vector<4x288xf32>
    %9 = arith.addf %3, %8 : vector<4x288xf32>
    %c1 = arith.constant 1 : index
    %c0_8 = arith.constant 0 : index
    %c0_9 = arith.constant 0 : index
    %10 = vector.load %arg3[%c1, %c0_8, %c0_9] : memref<9x4x4xbf16, #tpu.memory_space<vmem>>, vector<1x4x4xbf16>
    %11 = vector.shape_cast %10 : vector<1x4x4xbf16> to vector<4x4xbf16>
    %c0_10 = arith.constant 0 : index
    %c0_11 = arith.constant 0 : index
    %c1_12 = arith.constant 1 : index
    %12 = vector.load %arg4[%c0_10, %c0_11, %c1_12] : memref<1x4x326xbf16, #tpu.memory_space<vmem>>, vector<1x4x288xbf16>
    %13 = vector.shape_cast %12 : vector<1x4x288xbf16> to vector<4x288xbf16>
    %cst_13 = arith.constant dense<0.000000e+00> : vector<4x288xf32>
    %14 = tpu.matmul %11, %13, %cst_13 {dimension_numbers = #tpu.dot_dimension_numbers<[1], [0], [0], [1], [0, 0, 1, 1], [], []>} : vector<4x4xbf16>, vector<4x288xbf16>, vector<4x288xf32> -> vector<4x288xf32>
    %15 = arith.addf %9, %14 : vector<4x288xf32>
    %c2 = arith.constant 2 : index
    %c0_14 = arith.constant 0 : index
    %c0_15 = arith.constant 0 : index
    %16 = vector.load %arg3[%c2, %c0_14, %c0_15] : memref<9x4x4xbf16, #tpu.memory_space<vmem>>, vector<1x4x4xbf16>
    %17 = vector.shape_cast %16 : vector<1x4x4xbf16> to vector<4x4xbf16>
    %c0_16 = arith.constant 0 : index
    %c0_17 = arith.constant 0 : index
    %c2_18 = arith.constant 2 : index
    %18 = vector.load %arg4[%c0_16, %c0_17, %c2_18] : memref<1x4x326xbf16, #tpu.memory_space<vmem>>, vector<1x4x288xbf16>
    %19 = vector.shape_cast %18 : vector<1x4x288xbf16> to vector<4x288xbf16>
    %cst_19 = arith.constant dense<0.000000e+00> : vector<4x288xf32>
    %20 = tpu.matmul %17, %19, %cst_19 {dimension_numbers = #tpu.dot_dimension_numbers<[1], [0], [0], [1], [0, 0, 1, 1], [], []>} : vector<4x4xbf16>, vector<4x288xbf16>, vector<4x288xf32> -> vector<4x288xf32>
    %21 = arith.addf %15, %20 : vector<4x288xf32>
    %c3 = arith.constant 3 : index
    %c0_20 = arith.constant 0 : index
    %c0_21 = arith.constant 0 : index
    %22 = vector.load %arg3[%c3, %c0_20, %c0_21] : memref<9x4x4xbf16, #tpu.memory_space<vmem>>, vector<1x4x4xbf16>
    %23 = vector.shape_cast %22 : vector<1x4x4xbf16> to vector<4x4xbf16>
    %c0_22 = arith.constant 0 : index
    %c0_23 = arith.constant 0 : index
    %c18 = arith.constant 18 : index
    %24 = vector.load %arg4[%c0_22, %c0_23, %c18] : memref<1x4x326xbf16, #tpu.memory_space<vmem>>, vector<1x4x288xbf16>
    %25 = vector.shape_cast %24 : vector<1x4x288xbf16> to vector<4x288xbf16>
    %cst_24 = arith.constant dense<0.000000e+00> : vector<4x288xf32>
    %26 = tpu.matmul %23, %25, %cst_24 {dimension_numbers = #tpu.dot_dimension_numbers<[1], [0], [0], [1], [0, 0, 1, 1], [], []>} : vector<4x4xbf16>, vector<4x288xbf16>, vector<4x288xf32> -> vector<4x288xf32>
    %27 = arith.addf %21, %26 : vector<4x288xf32>
    %c4 = arith.constant 4 : index
    %c0_25 = arith.constant 0 : index
    %c0_26 = arith.constant 0 : index
    %28 = vector.load %arg3[%c4, %c0_25, %c0_26] : memref<9x4x4xbf16, #tpu.memory_space<vmem>>, vector<1x4x4xbf16>
    %29 = vector.shape_cast %28 : vector<1x4x4xbf16> to vector<4x4xbf16>
    %c0_27 = arith.constant 0 : index
    %c0_28 = arith.constant 0 : index
    %c19 = arith.constant 19 : index
    %30 = vector.load %arg4[%c0_27, %c0_28, %c19] : memref<1x4x326xbf16, #tpu.memory_space<vmem>>, vector<1x4x288xbf16>
    %31 = vector.shape_cast %30 : vector<1x4x288xbf16> to vector<4x288xbf16>
    %cst_29 = arith.constant dense<0.000000e+00> : vector<4x288xf32>
    %32 = tpu.matmul %29, %31, %cst_29 {dimension_numbers = #tpu.dot_dimension_numbers<[1], [0], [0], [1], [0, 0, 1, 1], [], []>} : vector<4x4xbf16>, vector<4x288xbf16>, vector<4x288xf32> -> vector<4x288xf32>
    %33 = arith.addf %27, %32 : vector<4x288xf32>
    %c5 = arith.constant 5 : index
    %c0_30 = arith.constant 0 : index
    %c0_31 = arith.constant 0 : index
    %34 = vector.load %arg3[%c5, %c0_30, %c0_31] : memref<9x4x4xbf16, #tpu.memory_space<vmem>>, vector<1x4x4xbf16>
    %35 = vector.shape_cast %34 : vector<1x4x4xbf16> to vector<4x4xbf16>
    %c0_32 = arith.constant 0 : index
    %c0_33 = arith.constant 0 : index
    %c20 = arith.constant 20 : index
    %36 = vector.load %arg4[%c0_32, %c0_33, %c20] : memref<1x4x326xbf16, #tpu.memory_space<vmem>>, vector<1x4x288xbf16>
    %37 = vector.shape_cast %36 : vector<1x4x288xbf16> to vector<4x288xbf16>
    %cst_34 = arith.constant dense<0.000000e+00> : vector<4x288xf32>
    %38 = tpu.matmul %35, %37, %cst_34 {dimension_numbers = #tpu.dot_dimension_numbers<[1], [0], [0], [1], [0, 0, 1, 1], [], []>} : vector<4x4xbf16>, vector<4x288xbf16>, vector<4x288xf32> -> vector<4x288xf32>
    %39 = arith.addf %33, %38 : vector<4x288xf32>
    %c6 = arith.constant 6 : index
    %c0_35 = arith.constant 0 : index
    %c0_36 = arith.constant 0 : index
    %40 = vector.load %arg3[%c6, %c0_35, %c0_36] : memref<9x4x4xbf16, #tpu.memory_space<vmem>>, vector<1x4x4xbf16>
    %41 = vector.shape_cast %40 : vector<1x4x4xbf16> to vector<4x4xbf16>
    %c0_37 = arith.constant 0 : index
    %c0_38 = arith.constant 0 : index
    %c36 = arith.constant 36 : index
    %42 = vector.load %arg4[%c0_37, %c0_38, %c36] : memref<1x4x326xbf16, #tpu.memory_space<vmem>>, vector<1x4x288xbf16>
    %43 = vector.shape_cast %42 : vector<1x4x288xbf16> to vector<4x288xbf16>
    %cst_39 = arith.constant dense<0.000000e+00> : vector<4x288xf32>
    %44 = tpu.matmul %41, %43, %cst_39 {dimension_numbers = #tpu.dot_dimension_numbers<[1], [0], [0], [1], [0, 0, 1, 1], [], []>} : vector<4x4xbf16>, vector<4x288xbf16>, vector<4x288xf32> -> vector<4x288xf32>
    %45 = arith.addf %39, %44 : vector<4x288xf32>
    %c7 = arith.constant 7 : index
    %c0_40 = arith.constant 0 : index
    %c0_41 = arith.constant 0 : index
    %46 = vector.load %arg3[%c7, %c0_40, %c0_41] : memref<9x4x4xbf16, #tpu.memory_space<vmem>>, vector<1x4x4xbf16>
    %47 = vector.shape_cast %46 : vector<1x4x4xbf16> to vector<4x4xbf16>
    %c0_42 = arith.constant 0 : index
    %c0_43 = arith.constant 0 : index
    %c37 = arith.constant 37 : index
    %48 = vector.load %arg4[%c0_42, %c0_43, %c37] : memref<1x4x326xbf16, #tpu.memory_space<vmem>>, vector<1x4x288xbf16>
    %49 = vector.shape_cast %48 : vector<1x4x288xbf16> to vector<4x288xbf16>
    %cst_44 = arith.constant dense<0.000000e+00> : vector<4x288xf32>
    %50 = tpu.matmul %47, %49, %cst_44 {dimension_numbers = #tpu.dot_dimension_numbers<[1], [0], [0], [1], [0, 0, 1, 1], [], []>} : vector<4x4xbf16>, vector<4x288xbf16>, vector<4x288xf32> -> vector<4x288xf32>
    %51 = arith.addf %45, %50 : vector<4x288xf32>
    %c8 = arith.constant 8 : index
    %c0_45 = arith.constant 0 : index
    %c0_46 = arith.constant 0 : index
    %52 = vector.load %arg3[%c8, %c0_45, %c0_46] : memref<9x4x4xbf16, #tpu.memory_space<vmem>>, vector<1x4x4xbf16>
    %53 = vector.shape_cast %52 : vector<1x4x4xbf16> to vector<4x4xbf16>
    %c0_47 = arith.constant 0 : index
    %c0_48 = arith.constant 0 : index
    %c38 = arith.constant 38 : index
    %54 = vector.load %arg4[%c0_47, %c0_48, %c38] : memref<1x4x326xbf16, #tpu.memory_space<vmem>>, vector<1x4x288xbf16>
    %55 = vector.shape_cast %54 : vector<1x4x288xbf16> to vector<4x288xbf16>
    %cst_49 = arith.constant dense<0.000000e+00> : vector<4x288xf32>
    %56 = tpu.matmul %53, %55, %cst_49 {dimension_numbers = #tpu.dot_dimension_numbers<[1], [0], [0], [1], [0, 0, 1, 1], [], []>} : vector<4x4xbf16>, vector<4x288xbf16>, vector<4x288xf32> -> vector<4x288xf32>
    %57 = arith.addf %51, %56 : vector<4x288xf32>
    %c0_50 = arith.constant 0 : index
    %c0_51 = arith.constant 0 : index
    %58 = vector.load %arg6[%c0_50, %c0_51] : memref<4x288xf32, #tpu.memory_space<vmem>>, vector<4x288xf32>
    tpu.vector_store %arg6[%c0_50, %c0_51], %57 {strides = array<i32>} : memref<4x288xf32, #tpu.memory_space<vmem>>, vector<4x288xf32>,
    %c0_i32_52 = arith.constant 0 : i32
    %59 = arith.cmpi eq, %arg2, %c0_i32_52 : i32
    %60 = arith.extui %59 : i1 to i32
    %c0_i32_53 = arith.constant 0 : i32
    %61 = arith.cmpi ne, %60, %c0_i32_53 : i32
    scf.if %61 {
      %c0_54 = arith.constant 0 : index
      %c0_55 = arith.constant 0 : index
      %62 = vector.load %arg6[%c0_54, %c0_55] : memref<4x288xf32, #tpu.memory_space<vmem>>, vector<4x288xf32>
      %cst_56 = arith.constant 0.000000e+00 : f32
      %63 = vector.broadcast %cst_56 : f32 to vector<4x288xf32>
      %64 = arith.cmpf oge, %62, %63 : vector<4x288xf32>
      %cst_57 = arith.constant 1.000000e-01 : f32
      %65 = vector.broadcast %cst_57 : f32 to vector<4x288xf32>
      %66 = arith.mulf %62, %65 : vector<4x288xf32>
      %67 = arith.select %64, %62, %66 : vector<4x288xi1>, vector<4x288xf32>
      %c0_58 = arith.constant 0 : index
      %c0_59 = arith.constant 0 : index
      %c0_60 = arith.constant 0 : index
      %68 = vector.load %arg5[%c0_58, %c0_59, %c0_60] : memref<1x4x288xf32, #tpu.memory_space<vmem>>, vector<1x4x288xf32>
      %69 = vector.shape_cast %68 : vector<1x4x288xf32> to vector<4x288xf32>
      %70 = vector.shape_cast %67 : vector<4x288xf32> to vector<1x4x288xf32>
      tpu.vector_store %arg5[%c0_58, %c0_59, %c0_60], %70 {strides = array<i32>} : memref<1x4x288xf32, #tpu.memory_space<vmem>>, vector<1x4x288xf32>,
    } else {
    }
    return
  }
  func.func @transform_0(%arg0: i32, %arg1: i32, %arg2: i32) -> (i32, i32, i32) {
    %c0_i32 = arith.constant 0 : i32
    %c0_i32_0 = arith.constant 0 : i32
    return %c0_i32, %arg1, %arg2 : i32, i32, i32
  }
  func.func @transform_1(%arg0: i32, %arg1: i32, %arg2: i32) -> (i32, i32, i32) {
    %c0_i32 = arith.constant 0 : i32
    %c0_i32_0 = arith.constant 0 : i32
    return %arg0, %arg2, %c0_i32 : i32, i32, i32
  }
  func.func @transform_2(%arg0: i32, %arg1: i32, %arg2: i32) -> (i32, i32, i32) {
    %c0_i32 = arith.constant 0 : i32
    %c0_i32_0 = arith.constant 0 : i32
    return %arg0, %arg1, %c0_i32 : i32, i32, i32
  }
}

</mosaic_0001>

<bundles_post_ra>
// kernel: tpu_custom_call.1
= control target key start
LH: loop header
LB: loop body
LE: loop exit
PB: predicated region body
PF: predicated region fallthrough
CT: control target
= control target key end

     0   :  { %7 = vsyncpa [#allocation4], 0  ;;  %s1467_s0 = inlined_call_operand.vmem [shape: bf16[9,4,4], index: 0, kind: input, shape index: {}]   ;;  %s1468_s1 = inlined_call_operand.vmem [shape: bf16[2,4,326], index: 1, kind: input, shape index: {}]   ;;  %s1469_s2 = inlined_call_operand.hbm [shape: f32[2,4,288], index: 2, kind: output, shape index: {}]  }
   0x1   :  { %9 = vsyncpa [#allocation4 + $0x1], 0  ;;  %s1255_s9 = smov 0   ;;  %s1257_s10 = smov 0  }
   0x2   :  { %s1259_s11 = smov 0   ;;  %s1261_s12 = smov 0  }
   0x3   :  { %s1263_s13 = smov 0   ;;  %s1265_s14 = smov 0  }
   0x4 LB: > { %s1039_s15 = sadd.s32 4294967295, %s1229_s14   ;;  %s1040_s16 = sadd.s32 4294967294, %s1229_s14   ;;  %s1229_s14 = sphi %s1265_s14, %s15_s14   ;;  %s1225_s13 = sphi %s1263_s13, %s1476_s13   ;;  %s1221_s12 = sphi %s1261_s12, %s1475_s12   ;;  %s1217_s11 = sphi %s1259_s11, %s1474_s11   ;;  %s1213_s10 = sphi %s1257_s10, %s1473_s10   ;;  %s1209_s9 = sphi %s1255_s9, %s1472_s9  }
   0x5   : > { %s34_s17 = sadd.s32 1, %s1225_s13  ;;  %s99_s18 = sadd.s32 1, %s1217_s11 }
   0x6   : > { %p36_p0 = scmp.ge.s32.totalorder %s34_s17, 2  ;;  %p109_p1 = scmp.ne.s32.totalorder %s1217_s11, %s1213_s10 }
   0x7   : > { %p110_p2 = scmp.eq.s32.totalorder %s1039_s15, 1  ;;  %p115_p3 = scmp.ne.s32.totalorder %s1213_s10, %s1209_s9 }
   0x8   : > { %s1478_s17 = smov (%p36_p0, %s34_s17), 0  ;;  %p116_p5 = scmp.eq.s32.totalorder %s1040_s16, 1 }
   0x9   : > { %p1295_p4 = por %p110_p2, %p109_p1  ;;  %s94_s20 = ssub.s32 %s1225_s13, %s1478_s17 }
   0xa   : > { %p1044_p6 = scmp.ge.s32.totalorder %s1229_s14, 1  ;;  %p97_p7 = scmp.eq.s32.totalorder %s94_s20, 0 }
   0xb   : > { %p1302_p8 = por %p116_p5, %p115_p3  ;;  %p156_p9 = scmp.lt.s32.totalorder %s1229_s14, 3 }
   0xc   : > { %s1308_s22 = scalar_select %p97_p7, %s1217_s11, %s99_s18  }
   0xd   : > { %p157_p10 = pnand %p1044_p6, %p156_p9 }
   0xe   : > { %p196_p11 = scmp.lt.s32.totalorder (!%p157_p10), %s1221_s12, 1  ;;  %s1231_s28 = smov (!%p157_p10), 127  }
   0xf   : > { %160 = sbr.rel (%p157_p10) target bundleno = 408 (0x198), region = 28  ;;  %s1232_s29 = smov (!%p157_p10), 126  }
  0x10   : > { %s1233_s30 = smov (!%p157_p10), 110   ;;  %s1234_s3 = smov (!%p157_p10), 109  }
  0x11   : > { %s1235_s6 = smov (!%p157_p10), 108   ;;  %s1236_s7 = smov (!%p157_p10), 92  }
  0x12   : > { %s1237_s8 = smov (!%p157_p10), 91   ;;  %s1238_s15 = smov (!%p157_p10), 90  }
  0x13   : > { %s1086_s18 = smul.u32 (!%p157_p10), 12, %s1221_s12 }
  0x14   : > { %s197_s23 = scalar_select %p196_p11, %s1221_s12, 1  ;;  %vm226_vm0 = vcmask 1041408   ;;  %v215_v25 = vld [vmem:[%s1467_s0] sm:$0x3]  ;;  %vm222_vm1 = vcmask 31744   ;;  %vm297_vm2 = vcmask 1039360  }
  0x15   : > { %v1049_v42 = vld [vmem:[%s1467_s0 + $0x2] sm:$0x3]  ;;  %vm375_vm3 = vcmask 1031168   ;;  %vm453_vm4 = vcmask 900096   ;;  %v1053_v60 = vld [vmem:[%s1467_s0 + $0x4] sm:$0x3] }
  0x16   : > { %s1085_s24 = smul.u32 6, %s197_s23  ;;  %v1057_v62 = vld [vmem:[%s1467_s0 + $0x6] sm:$0x3]  ;;  %vm531_vm5 = vcmask 891904   ;;  %vm609_vm6 = vcmask 883712   ;;  %vm687_vm7 = vcmask 752640  }
  0x17   : > { %vm765_vm8 = vcmask 744448   ;;  %vm843_vm9 = vcmask 736256   ;;  %vm275_vm10 = vcmask 1043456   ;;  %vm211_vm11 = vcmask 257024  }
  0x18   : > { %s1315_s27 = scalar_lea.vmem %s1468_s1, %s1085_s24  ;;  %s934_s24 = scalar_lea.hbm %s1469_s2, %s1086_s18 }
  0x19   : > { %v216_v0 = vld [vmem:[%s1315_s27] sm:$0x3f]  ;;  %s938_s26 = sshll.u32 %s934_s24, 4  ;;  %s939_s26 = int_to_ptr.hbm [resolvable:$true] %s938_s26 }
  0x1a   : > { %218 = vst [vmem:[#allocation1] ss:$4 sm:$0xff] %v216_v0  ;;  %v282_v1 = vld [vmem:[%s1315_s27] sm:$0x3f] }
  0x1b   : > { %v360_v5 = vld [vmem:[%s1315_s27] sm:$0x3f] }
  0x1c   : > { %v438_v9 = vld [vmem:[%s1315_s27] sm:$0x3f] }
  0x1d   : > { %v516_v13 = vld [vmem:[%s1315_s27] sm:$0x3f] }
  0x1e   : > { %v594_v17 = vld [vmem:[%s1315_s27] sm:$0x3f] }
  0x1f   : > { %v672_v21 = vld [vmem:[%s1315_s27] sm:$0x3f] }
  0x20   : > { %v750_v28 = vld [vmem:[%s1315_s27] sm:$0x3f] }
  0x21   : > { %v219_v2 = vld.sshfl [vmem:[#allocation1] sm:$0xff pattern:$0x73625140]  ;;  %v220_v3 = vld.sshfl [vmem:[#allocation1 + $0x8] sm:$0xff pattern:$0x73625140] }
  0x22   : > { %v1319_v4 = vld.sshfl [vmem:[#allocation1 + $0x10] sm:$0xff pattern:$0x73625140]  ;;  %v227_v22 = vsel %vm226_vm0, %v219_v2, 0  ;;  %v229_v23 = vsel %vm226_vm0, %v220_v3, 0 }
  0x23   : > { %284 = vst [vmem:[#allocation1] ss:$4 sm:$0xff] %v282_v1  ;;  %240 = vmatpush.bf16.msra.mxu0 %v227_v22  ;;  %253 = vmatpush.bf16.msra.mxu1 %v229_v23  ;;  %v828_v32 = vld [vmem:[%s1315_s27] sm:$0x3f]  ;;  %v231_v38 = vsel %vm226_vm0, %v1319_v4, 0  ;;  %s1165_s27 = sshra.s32 %s939_s26, 4  ;;  %s1166_s27 = int_to_ptr.hbm [resolvable:$true] %s1165_s27 }
  0x24   : > { %266 = vmatpush.bf16.msra.mxu2 %v231_v38  ;;  %p1172_p1 = scmp.lt.s32.totalorder %s1166_s27, %s1469_s2 }
  0x26   : > { %1046 = vmatmul.msk.bf16.vlgmr.msra.gmra.mxu0 %vm222_vm1, %v215_v25  ;;  %1047 = vmatmul.msk.bf16.vlgmr.msra.gmra.mxu1 %vm222_vm1, %v215_v25 }
  0x27   : > { %1048 = vmatmul.msk.bf16.vlgmr.msra.gmra.mxu2 %vm222_vm1, %v215_v25 }
  0x2a   : > { %v285_v6 = vld.sshfl [vmem:[#allocation1] sm:$0xff pattern:$0x73625140]  ;;  %v287_v7 = vld.sshfl [vmem:[#allocation1 + $0x8] sm:$0xff pattern:$0x73625140] }
  0x2b   : > { %291 = vrot.lane.b32.xlu0 %v285_v6, %s1231_s28  ;;  %v289_v8 = vld.sshfl [vmem:[#allocation1 + $0x10] sm:$0xff pattern:$0x73625140] }
  0x2c   : > { %362 = vst [vmem:[#allocation1] ss:$4 sm:$0xff] %v360_v5  ;;  %295 = vrot.lane.b32.xlu2 %v289_v8, %s1231_s28 }
  0x33   : > { %293 = vrot.lane.b32.xlu0 %v287_v7, %s1231_s28  ;;  %v367_v10 = vld.sshfl [vmem:[#allocation1 + $0x10] sm:$0xff pattern:$0x73625140]  ;;  %v363_v11 = vld.sshfl [vmem:[#allocation1] sm:$0xff pattern:$0x73625140] }
  0x34   : > { %369 = vrot.lane.b32.xlu1 %v363_v11, %s1232_s29  ;;  %v365_v12 = vld.sshfl [vmem:[#allocation1 + $0x8] sm:$0xff pattern:$0x73625140]  ;;  %373 = vrot.lane.b32.xlu2 %v367_v10, %s1232_s29  ;;  %s1167_s28 = scalar_lea.hbm %s1166_s27, 12 }
  0x35   : > { %440 = vst [vmem:[#allocation1] ss:$4 sm:$0xff] %v438_v9  ;;  %p1168_p12 = scmp.ne.s32.totalorder %s1166_s27, %s1167_s28 }
  0x37   : > { %p1169_p13 = pnand %p1168_p12, %p1295_p4 }
  0x39   : > { %p1170_p0 = pneg %p1169_p13 }
  0x3c   : > { %371 = vrot.lane.b32.xlu1 %v365_v12, %s1232_s29  ;;  %v443_v14 = vld.sshfl [vmem:[#allocation1 + $0x8] sm:$0xff pattern:$0x73625140]  ;;  %v441_v15 = vld.sshfl [vmem:[#allocation1] sm:$0xff pattern:$0x73625140] }
  0x3d   : > { %449 = vrot.lane.b32.xlu0 %v443_v14, %s1233_s30  ;;  %v445_v16 = vld.sshfl [vmem:[#allocation1 + $0x10] sm:$0xff pattern:$0x73625140]  ;;  %447 = vrot.lane.b32.xlu2 %v441_v15, %s1233_s30  ;;  %v1061_v12 = vld [vmem:[%s1467_s0 + $0x8] sm:$0x3] }
  0x3e   : > { %518 = vst [vmem:[#allocation1] ss:$4 sm:$0xff] %v516_v13 }
  0x44   : > { %451 = vrot.lane.b32.xlu1 %v445_v16, %s1233_s30 }
  0x45   : > { %v523_v18 = vld.sshfl [vmem:[#allocation1 + $0x10] sm:$0xff pattern:$0x73625140]  ;;  %v519_v19 = vld.sshfl [vmem:[#allocation1] sm:$0xff pattern:$0x73625140] }
  0x46   : > { %529 = vrot.lane.b32.xlu0 %v523_v18, %s1234_s3  ;;  %v521_v20 = vld.sshfl [vmem:[#allocation1 + $0x8] sm:$0xff pattern:$0x73625140]  ;;  %525 = vrot.lane.b32.xlu2 %v519_v19, %s1234_s3 }
  0x47   : > { %596 = vst [vmem:[#allocation1] ss:$4 sm:$0xff] %v594_v17 }
  0x4c   : > { %527 = vrot.lane.b32.xlu1 %v521_v20, %s1234_s3  ;;  %s1171_s3 = scalar_lea.hbm %s1469_s2, 24 }
  0x4d   : > { %p1173_p2 = scmp.lt.s32.totalorder %s1171_s3, %s1167_s28 }
  0x4e   : > { %v601_v24 = vld.sshfl [vmem:[#allocation1 + $0x10] sm:$0xff pattern:$0x73625140]  ;;  %v599_v26 = vld.sshfl [vmem:[#allocation1 + $0x8] sm:$0xff pattern:$0x73625140] }
  0x4f   : > { %v597_v27 = vld.sshfl [vmem:[#allocation1] sm:$0xff pattern:$0x73625140]  ;;  %p1174_p3 = por %p1173_p2, %p1172_p1 }
  0x50   : > { %603 = vrot.lane.b32.xlu0 %v597_v27, %s1235_s6  ;;  %674 = vst [vmem:[#allocation1] ss:$4 sm:$0xff] %v672_v21 }
  0x51   : > { %p1175_p5 = pnand %p1174_p3, %p1170_p0 }
  0x54   : > { %605 = vrot.lane.b32.xlu1 %v599_v26, %s1235_s6 }
  0x57   : > { %v677_v29 = vld.sshfl [vmem:[#allocation1 + $0x8] sm:$0xff pattern:$0x73625140]  ;;  %v679_v30 = vld.sshfl [vmem:[#allocation1 + $0x10] sm:$0xff pattern:$0x73625140] }
  0x58   : > { %683 = vrot.lane.b32.xlu0 %v677_v29, %s1236_s7  ;;  %v675_v31 = vld.sshfl [vmem:[#allocation1] sm:$0xff pattern:$0x73625140]  ;;  %v1065_v29 = vld [vmem:[%s1467_s0 + $0xa] sm:$0x3] }
  0x59   : > { %752 = vst [vmem:[#allocation1] ss:$4 sm:$0xff] %v750_v28  ;;  %681 = vrot.lane.b32.xlu2 %v675_v31, %s1236_s7 }
  0x5c   : > { %607 = vrot.lane.b32.xlu1 %v601_v24, %s1235_s6 }
  0x60   : > { %v755_v33 = vld.sshfl [vmem:[#allocation1 + $0x8] sm:$0xff pattern:$0x73625140]  ;;  %v753_v34 = vld.sshfl [vmem:[#allocation1] sm:$0xff pattern:$0x73625140] }
  0x61   : > { %761 = vrot.lane.b32.xlu0 %v755_v33, %s1237_s8  ;;  %v757_v35 = vld.sshfl [vmem:[#allocation1 + $0x10] sm:$0xff pattern:$0x73625140]  ;;  %685 = vrot.lane.b32.xlu2 %v679_v30, %s1236_s7 }
  0x62   : > { %830 = vst [vmem:[#allocation1] ss:$4 sm:$0xff] %v828_v32 }
  0x64   : > { %763 = vrot.lane.b32.xlu1 %v757_v35, %s1237_s8 }
  0x69   : > { %v835_v36 = vld.sshfl [vmem:[#allocation1 + $0x10] sm:$0xff pattern:$0x73625140]  ;;  %v833_v37 = vld.sshfl [vmem:[#allocation1 + $0x8] sm:$0xff pattern:$0x73625140]  ;;  %759 = vrot.lane.b32.xlu2 %v753_v34, %s1237_s8 }
  0x6a   : > { %841 = vrot.lane.b32.xlu0 %v835_v36, %s1238_s15  ;;  %v831_v39 = vld.sshfl [vmem:[#allocation1] sm:$0xff pattern:$0x73625140]  ;;  %s186_s8 = sand.u32 1, %s1213_s10  }
  0x6b   : > { %s921_s12 = scalar_lea.sflag [#allocation4], %s186_s8 }
  0x6c   : > { %839 = vrot.lane.b32.xlu1 %v833_v37, %s1238_s15 }
  0x71   : > { %837 = vrot.lane.b32.xlu2 %v831_v39, %s1238_s15  ;;  %s1084_s15 = smul.u32 12, %s186_s8 }
  0x73   : > { %s188_s16 = scalar_lea.vmem [#allocation3], %s1084_s15 }
  0x74   : > { %s936_s25 = sshll.u32 %s188_s16, 4  ;;  %s937_s25 = int_to_ptr.vmem [resolvable:$true] %s936_s25 }
  0x86   : > { %v296_v40 = vpop.permute.xlu2 %295 }
  0x87   : > { %v310_v41 = vsel %vm226_vm0, %v296_v40, 0 }
  0x88   : > { %345 = vmatpush.bf16.msrb.mxu1 %v310_v41 }
  0x8b   : > { %1052 = vmatmul.msk.bf16.vlgmr.msrb.gmra.mxu1 %vm222_vm1, %v1049_v42 }
  0x8e   : > { %v374_v44 = vpop.permute.xlu2 %373 }
  0x8f   : > { %v388_v49 = vsel %vm226_vm0, %v374_v44, 0 }
  0x97   : > { %v448_v52 = vpop.permute.xlu2 %447 }
  0x9d   : > { %v292_v43 = vpop.permute.xlu0 %291 }
  0xa0   : > { %v526_v63 = vpop.permute.xlu2 %525 }
  0xa5   : > { %v294_v45 = vpop.permute.xlu0 %293 }
  0xa6   : > { %v370_v46 = vpop.permute.xlu1 %369  ;;  %v298_v47 = vsel %vm297_vm2, %v292_v43, %v294_v45  ;;  %v299_v48 = vsel %vm297_vm2, %v294_v45, %v296_v40  ;;  %v1073_v45 = vld [vmem:[%s1467_s0 + $0xe] sm:$0x3] }
  0xa7   : > { %v304_v50 = vsel %vm226_vm0, %v298_v47, 0  ;;  %v307_v51 = vsel %vm226_vm0, %v299_v48, 0  ;;  %v242_v47 = vpop.f32.mrf.mxu0  ;;  %v255_v48 = vpop.f32.mrf.mxu1 }
  0xa8   : > { %319 = vmatpush.bf16.msra.mxu3 %v304_v50  ;;  %332 = vmatpush.bf16.msrb.mxu0 %v307_v51  ;;  %v1239_v50 = vmov 0.0  }
  0xa9   : > { %212 = vst.msk [vmem:[#allocation2 + $0x8] sm:$0xf] %vm211_vm11, %v1239_v50 }
  0xab   : > { %1050 = vmatmul.msk.bf16.vlgmr.msra.gmra.mxu3 %vm222_vm1, %v1049_v42  ;;  %1051 = vmatmul.msk.bf16.vlgmr.msrb.gmra.mxu0 %vm222_vm1, %v1049_v42 }
  0xac   : > { %423 = vmatpush.bf16.msra.mxu0 %v388_v49  ;;  %v274_v49 = vrot.slane %v255_v48, 4 }
  0xae   : > { %v372_v53 = vpop.permute.xlu1 %371  ;;  %v276_v51 = vsel %vm275_vm10, %v242_v47, %v274_v49 }
  0xaf   : > { %v376_v54 = vsel %vm375_vm3, %v370_v46, %v372_v53  ;;  %v377_v55 = vsel %vm375_vm3, %v372_v53, %v374_v44  ;;  %v450_v56 = vpop.permute.xlu0 %449  ;;  %v1069_v44 = vld [vmem:[%s1467_s0 + $0xc] sm:$0x3]  ;;  %v257_v53 = vpop.f32.mrf.mxu1 }
  0xb0   : > { %v382_v57 = vsel %vm226_vm0, %v376_v54, 0  ;;  %v385_v58 = vsel %vm226_vm0, %v377_v55, 0  ;;  %v454_v59 = vsel %vm453_vm4, %v448_v52, %v450_v56  ;;  %v244_v52 = vpop.f32.mrf.mxu0  ;;  %v1077_v54 = vld [vmem:[%s1467_s0 + $0x10] sm:$0x3]  ;;  %v268_v55 = vpop.f32.mrf.mxu2 }
  0xb1   : > { %397 = vmatpush.bf16.msrb.mxu2 %v382_v57  ;;  %410 = vmatpush.bf16.msrb.mxu3 %v385_v58  ;;  %v460_v61 = vsel %vm226_vm0, %v454_v59, 0 }
  0xb2   : > { %475 = vmatpush.bf16.msra.mxu1 %v460_v61 }
  0xb3   : > { %v682_v6 = vpop.permute.xlu2 %681 }
  0xb4   : > { %1054 = vmatmul.msk.bf16.vlgmr.msrb.gmra.mxu2 %vm222_vm1, %v1053_v60 }
  0xb5   : > { %1058 = vmatmul.msk.bf16.vlgmr.msra.gmra.mxu1 %vm222_vm1, %v1057_v62 }
  0xb6   : > { %v452_v0 = vpop.permute.xlu1 %451 }
  0xb7   : > { %v455_v1 = vsel %vm453_vm4, %v450_v56, %v452_v0  ;;  %v466_v2 = vsel %vm226_vm0, %v452_v0, 0  ;;  %v214_v56 = vld [vmem:[#allocation2 + $0x8] sm:$0xf] }
  0xb8   : > { %v463_v3 = vsel %vm226_vm0, %v455_v1, 0  ;;  %501 = vmatpush.bf16.msra.mxu3 %v466_v2  ;;  %v530_v4 = vpop.permute.xlu0 %529  ;;  %v279_v57 = vadd.f32 %v268_v55, %v214_v56  ;;  %v270_v58 = vpop.f32.mrf.mxu2 }
  0xb9   : > { %488 = vmatpush.bf16.msra.mxu2 %v463_v3  ;;  %v544_v5 = vsel %vm226_vm0, %v530_v4, 0 }
  0xbb   : > { %1055 = vmatmul.msk.bf16.vlgmr.msrb.gmra.mxu3 %vm222_vm1, %v1053_v60  ;;  %1056 = vmatmul.msk.bf16.vlgmr.msra.gmra.mxu0 %vm222_vm1, %v1053_v60  ;;  %v686_v16 = vpop.permute.xlu2 %685 }
  0xbc   : > { %v700_v26 = vsel %vm226_vm0, %v686_v16, 0 }
  0xbd   : > { %579 = vmatpush.bf16.msrb.mxu2 %v544_v5 }
  0xbe   : > { %v528_v7 = vpop.permute.xlu1 %527 }
  0xbf   : > { %v533_v8 = vsel %vm531_vm5, %v528_v7, %v530_v4  ;;  %v532_v9 = vsel %vm531_vm5, %v526_v63, %v528_v7 }
  0xc0   : > { %v541_v10 = vsel %vm226_vm0, %v533_v8, 0  ;;  %v538_v11 = vsel %vm226_vm0, %v532_v9, 0 }
  0xc1   : > { %553 = vmatpush.bf16.msrb.mxu0 %v538_v11  ;;  %566 = vmatpush.bf16.msrb.mxu1 %v541_v10 }
  0xc2   : > { %v604_v13 = vpop.permute.xlu0 %603 }
  0xc3   : > { %v760_v28 = vpop.permute.xlu2 %759 }
  0xc4   : > { %1059 = vmatmul.msk.bf16.vlgmr.msra.gmra.mxu2 %vm222_vm1, %v1057_v62 }
  0xc5   : > { %1063 = vmatmul.msk.bf16.vlgmr.msrb.gmra.mxu1 %vm222_vm1, %v1061_v12 }
  0xc6   : > { %v606_v14 = vpop.permute.xlu1 %605 }
  0xc7   : > { %v610_v15 = vsel %vm609_vm6, %v604_v13, %v606_v14 }
  0xc8   : > { %v616_v17 = vsel %vm226_vm0, %v610_v15, 0 }
  0xc9   : > { %631 = vmatpush.bf16.msrb.mxu3 %v616_v17 }
  0xca   : > { %v684_v18 = vpop.permute.xlu0 %683 }
  0xcb   : > { %1060 = vmatmul.msk.bf16.vlgmr.msra.gmra.mxu3 %vm222_vm1, %v1057_v62  ;;  %1062 = vmatmul.msk.bf16.vlgmr.msrb.gmra.mxu0 %vm222_vm1, %v1061_v12  ;;  %v688_v19 = vsel %vm687_vm7, %v682_v6, %v684_v18  ;;  %v689_v20 = vsel %vm687_vm7, %v684_v18, %v686_v16  ;;  %v838_v38 = vpop.permute.xlu2 %837 }
  0xcc   : > { %v694_v21 = vsel %vm226_vm0, %v688_v19, 0  ;;  %v697_v22 = vsel %vm226_vm0, %v689_v20, 0 }
  0xcd   : > { %709 = vmatpush.bf16.msra.mxu2 %v694_v21  ;;  %722 = vmatpush.bf16.msra.mxu3 %v697_v22 }
  0xce   : > { %v608_v23 = vpop.permute.xlu1 %607 }
  0xcf   : > { %v611_v24 = vsel %vm609_vm6, %v606_v14, %v608_v23  ;;  %v622_v25 = vsel %vm226_vm0, %v608_v23, 0 }
  0xd0   : > { %v619_v27 = vsel %vm226_vm0, %v611_v24, 0  ;;  %657 = vmatpush.bf16.msra.mxu1 %v622_v25 }
  0xd1   : > { %644 = vmatpush.bf16.msra.mxu0 %v619_v27 }
  0xd3   : > { %v762_v30 = vpop.permute.xlu0 %761 }
  0xd4   : > { %1064 = vmatmul.msk.bf16.vlgmr.msrb.gmra.mxu2 %vm222_vm1, %v1061_v12  ;;  %v766_v31 = vsel %vm765_vm8, %v760_v28, %v762_v30 }
  0xd5   : > { %735 = vmatpush.bf16.msrb.mxu0 %v700_v26  ;;  %1068 = vmatmul.msk.bf16.vlgmr.msra.gmra.mxu1 %vm222_vm1, %v1065_v29  ;;  %v772_v32 = vsel %vm226_vm0, %v766_v31, 0 }
  0xd6   : > { %787 = vmatpush.bf16.msrb.mxu1 %v772_v32  ;;  %v764_v33 = vpop.permute.xlu1 %763 }
  0xd7   : > { %v767_v34 = vsel %vm765_vm8, %v762_v30, %v764_v33  ;;  %v778_v36 = vsel %vm226_vm0, %v764_v33, 0 }
  0xd8   : > { %v775_v35 = vsel %vm226_vm0, %v767_v34, 0 }
  0xd9   : > { %800 = vmatpush.bf16.msrb.mxu2 %v775_v35 }
  0xdb   : > { %1066 = vmatmul.msk.bf16.vlgmr.msrb.gmra.mxu3 %vm222_vm1, %v1065_v29  ;;  %1067 = vmatmul.msk.bf16.vlgmr.msra.gmra.mxu0 %vm222_vm1, %v1065_v29 }
  0xdc   : > { %813 = vmatpush.bf16.msrb.mxu3 %v778_v36  ;;  %v842_v37 = vpop.permute.xlu0 %841 }
  0xdd   : > { %v856_v46 = vsel %vm226_vm0, %v842_v37, 0 }
  0xde   : > { %v840_v39 = vpop.permute.xlu1 %839 }
  0xdf   : > { %v845_v40 = vsel %vm843_vm9, %v840_v39, %v842_v37  ;;  %v844_v41 = vsel %vm843_vm9, %v838_v38, %v840_v39 }
  0xe0   : > { %v853_v42 = vsel %vm226_vm0, %v845_v40, 0  ;;  %v850_v43 = vsel %vm226_vm0, %v844_v41, 0 }
  0xe1   : > { %878 = vmatpush.bf16.msra.mxu1 %v853_v42  ;;  %865 = vmatpush.bf16.msra.mxu0 %v850_v43 }
  0xe4   : > { %1070 = vmatmul.msk.bf16.vlgmr.msra.gmra.mxu2 %vm222_vm1, %v1069_v44 }
  0xe5   : > { %1074 = vmatmul.msk.bf16.vlgmr.msrb.gmra.mxu1 %vm222_vm1, %v1073_v45  ;;  %891 = vmatpush.bf16.msra.mxu2 %v856_v46 }
  0xeb   : > { %1071 = vmatmul.msk.bf16.vlgmr.msra.gmra.mxu3 %vm222_vm1, %v1069_v44  ;;  %1072 = vmatmul.msk.bf16.vlgmr.msrb.gmra.mxu0 %vm222_vm1, %v1069_v44 }
  0xf4   : > { %1075 = vmatmul.msk.bf16.vlgmr.msrb.gmra.mxu2 %vm222_vm1, %v1073_v45 }
  0xf5   : > { %1079 = vmatmul.msk.bf16.vlgmr.msra.gmra.mxu1 %vm222_vm1, %v1077_v54 }
  0xfb   : > { %1076 = vmatmul.msk.bf16.vlgmr.msrb.gmra.mxu3 %vm222_vm1, %v1073_v45  ;;  %1078 = vmatmul.msk.bf16.vlgmr.msra.gmra.mxu0 %vm222_vm1, %v1077_v54 }
 0x104   : > { %1080 = vmatmul.msk.bf16.vlgmr.msra.gmra.mxu2 %vm222_vm1, %v1077_v54 }
 0x108   : > { %v347_v59 = vpop.f32.mrf.mxu1 }
 0x109   : > { %v357_v60 = vadd.f32 %v347_v59, %v279_v57 }
 0x110   : > { %v349_v61 = vpop.f32.mrf.mxu1 }
 0x128   : > { %v334_v62 = vpop.f32.mrf.mxu0 }
 0x129   : > { %v353_v63 = vrot.slane %v334_v62, 4 }
 0x12e   : > { %v321_v0 = vpop.f32.mrf.mxu3 }
 0x12f   : > { %v354_v1 = vsel %vm275_vm10, %v321_v0, %v353_v63 }
 0x130   : > { %v356_v2 = vadd.f32 %v354_v1, %v276_v51  ;;  %v336_v3 = vpop.f32.mrf.mxu0 }
 0x132   : > { %v477_v4 = vpop.f32.mrf.mxu1 }
 0x136   : > { %v323_v5 = vpop.f32.mrf.mxu3 }
 0x137   : > { %v399_v6 = vpop.f32.mrf.mxu2 }
 0x138   : > { %v425_v7 = vpop.f32.mrf.mxu0 }
 0x139   : > { %v435_v8 = vadd.f32 %v425_v7, %v357_v60 }
 0x13a   : > { %v479_v9 = vpop.f32.mrf.mxu1 }
 0x13e   : > { %v412_v10 = vpop.f32.mrf.mxu3 }
 0x13f   : > { %v401_v11 = vpop.f32.mrf.mxu2  ;;  %v431_v32 = vrot.slane %v412_v10, 4 }
 0x140   : > { %v427_v12 = vpop.f32.mrf.mxu0 }
 0x141   : > { %v432_v36 = vsel %vm275_vm10, %v399_v6, %v431_v32 }
 0x142   : > { %v568_v13 = vpop.f32.mrf.mxu1  ;;  %v434_v40 = vadd.f32 %v432_v36, %v356_v2 }
 0x143   : > { %v587_v38 = vrot.slane %v568_v13, 4 }
 0x146   : > { %v414_v14 = vpop.f32.mrf.mxu3 }
 0x147   : > { %v490_v15 = vpop.f32.mrf.mxu2 }
 0x148   : > { %v555_v16 = vpop.f32.mrf.mxu0  ;;  %v509_v34 = vrot.slane %v490_v15, 4 }
 0x149   : > { %v588_v45 = vsel %vm275_vm10, %v555_v16, %v587_v38 }
 0x14a   : > { %v570_v17 = vpop.f32.mrf.mxu1  ;;  %v510_v37 = vsel %vm275_vm10, %v477_v4, %v509_v34 }
 0x14b   : > { %v512_v44 = vadd.f32 %v510_v37, %v434_v40 }
 0x14d   : > { %v590_v49 = vadd.f32 %v588_v45, %v512_v44 }
 0x14e   : > { %v503_v18 = vpop.f32.mrf.mxu3 }
 0x14f   : > { %v492_v19 = vpop.f32.mrf.mxu2  ;;  %v513_v62 = vadd.f32 %v503_v18, %v435_v8 }
 0x150   : > { %v557_v20 = vpop.f32.mrf.mxu0 }
 0x152   : > { %v659_v21 = vpop.f32.mrf.mxu1 }
 0x156   : > { %v505_v22 = vpop.f32.mrf.mxu3 }
 0x157   : > { %v581_v23 = vpop.f32.mrf.mxu2 }
 0x158   : > { %v646_v24 = vpop.f32.mrf.mxu0  ;;  %v591_v0 = vadd.f32 %v581_v23, %v513_v62 }
 0x159   : > { %v665_v42 = vrot.slane %v646_v24, 4 }
 0x15a   : > { %v661_v25 = vpop.f32.mrf.mxu1  ;;  %v669_v6 = vadd.f32 %v659_v21, %v591_v0 }
 0x15e   : > { %v633_v26 = vpop.f32.mrf.mxu3 }
 0x15f   : > { %v583_v27 = vpop.f32.mrf.mxu2  ;;  %v666_v48 = vsel %vm275_vm10, %v633_v26, %v665_v42 }
 0x160   : > { %v648_v28 = vpop.f32.mrf.mxu0  ;;  %v668_v53 = vadd.f32 %v666_v48, %v590_v49 }
 0x162   : > { %v789_v29 = vpop.f32.mrf.mxu1 }
 0x166   : > { %v635_v30 = vpop.f32.mrf.mxu3 }
 0x167   : > { %v711_v31 = vpop.f32.mrf.mxu2 }
 0x168   : > { %v737_v33 = vpop.f32.mrf.mxu0 }
 0x169   : > { %v747_v7 = vadd.f32 %v737_v33, %v669_v6 }
 0x16a   : > { %v791_v35 = vpop.f32.mrf.mxu1 }
 0x16e   : > { %v724_v39 = vpop.f32.mrf.mxu3 }
 0x16f   : > { %v713_v41 = vpop.f32.mrf.mxu2  ;;  %v743_v46 = vrot.slane %v724_v39, 4 }
 0x170   : > { %v739_v43 = vpop.f32.mrf.mxu0 }
 0x171   : > { %v744_v50 = vsel %vm275_vm10, %v711_v31, %v743_v46 }
 0x172   : > { %v880_v47 = vpop.f32.mrf.mxu1  ;;  %v746_v57 = vadd.f32 %v744_v50, %v668_v53 }
 0x173   : > { %v899_v52 = vrot.slane %v880_v47, 4 }
 0x176   : > { %v726_v51 = vpop.f32.mrf.mxu3 }
 0x177   : > { %v802_v54 = vpop.f32.mrf.mxu2 }
 0x178   : > { %v821_v55 = vrot.slane %v802_v54, 4  ;;  %v867_v56 = vpop.f32.mrf.mxu0 }
 0x179   : > { %v900_v59 = vsel %vm275_vm10, %v867_v56, %v899_v52 }
 0x17a   : > { %v822_v58 = vsel %vm275_vm10, %v789_v29, %v821_v55  ;;  %v882_v60 = vpop.f32.mrf.mxu1 }
 0x17b   : > { %v824_v61 = vadd.f32 %v822_v58, %v746_v57 }
 0x17d   : > { %v902_v63 = vadd.f32 %v900_v59, %v824_v61 }
 0x17e   : > { %v815_v1 = vpop.f32.mrf.mxu3 }
 0x17f   : > { %v804_v2 = vpop.f32.mrf.mxu2  ;;  %vm912_vm12 = vcmp.ge.f32.partialorder %v902_v63, 0.0  ;;  %v914_v3 = vmul.f32 0.1, %v902_v63  ;;  %v825_v9 = vadd.f32 %v815_v1, %v747_v7 }
 0x180   : > { %v869_v4 = vpop.f32.mrf.mxu0 }
 0x181   : > { %v916_v5 = vsel %vm912_vm12, %v902_v63, %v914_v3 }
 0x182   : > { %918 = vst [vmem:[%s188_s16] sm:$0xff] %v916_v5 }
 0x186   : > { %v817_v10 = vpop.f32.mrf.mxu3 }
 0x187   : > { %v893_v11 = vpop.f32.mrf.mxu2 }
 0x188   : > { %v903_v12 = vadd.f32 %v893_v11, %v825_v9 }
 0x18a   : > { %906 = vst.msk [vmem:[#allocation2 + $0x8] sm:$0xf] %vm211_vm11, %v903_v12 }
 0x18f   : > { %v895_v8 = vpop.f32.mrf.mxu2 }
 0x191   : > { %v911_v13 = vld [vmem:[#allocation2 + $0x8] sm:$0xf] }
 0x192   : > { %vm913_vm13 = vcmp.ge.f32.partialorder %v911_v13, 0.0  ;;  %v915_v14 = vmul.f32 0.1, %v911_v13 }
 0x194   : > { %v917_v15 = vsel %vm913_vm13, %v911_v13, %v915_v14 }
 0x195   : > { %919 = vst.msk [vmem:[%s188_s16 + $0x8] sm:$0xf] %vm211_vm11, %v917_v15 }
 0x196   : > { %1178 = shalt.err (!%p1175_p5)
}
 0x197   : > { %1087 = dma.vmem_to_hbm [thread:$0]  (%p1295_p4), %s937_s25, 192, %s939_s26, %s921_s12  }
 0x198 PF: > { %p1093_p6 = scmp.ge.s32.totalorder %s1229_s14, 2  ;;  %s950_s6 = sand.u32 1, %s1209_s9  }
 0x199   : > { %s951_s7 = scalar_lea.sflag [#allocation4], %s950_s6 }
 0x19a   : > { %p1090_p7 = pnand %p1093_p6, %p1302_p8 }
 0x19c   : > { %p1091_p9 = pneg %p1090_p7 }
 0x19e   : > { %1204 = dma.done.wait (%p1091_p9), %s951_s7, 192  }
 0x19f   : > { %1206 = vsyncadd (%p1091_p9), %s951_s7, 4294967104  ;;  %s15_s14 = sadd.s32 1, %s1229_s14   ;;  %s1472_s9 = smov %s1213_s10 }
 0x1a0   : > { %p12_p10 = scmp.ge.s32.totalorder %s15_s14, 4   ;;  %s1473_s10 = smov %s1217_s11 }
 0x1a1   : > { %s1474_s11 = smov %s1308_s22  ;;  %s1475_s12 = smov %s1225_s13 }
 0x1a2   : > { %s1476_s13 = smov %s1478_s17  ;;  %14 = sbr.rel (!%p12_p10) target bundleno = 4 (0x4), region = 82 }
 0x1a7   :  { %957 = vsyncpa [#allocation4], 1 }
 0x1a8   :  { %959 = vsyncpa [#allocation4 + $0x1], 1 }

</bundles_post_ra>
